<compile_context>
chip_gen: v5e
topology: v5e:2x2
jax: 0.10.0
libtpu: 0.0.40
codegen_flags: <defaults>
</compile_context>

<pallas_src>
import jax
import jax.numpy as jnp
from jax import lax
from jax.experimental import pallas as pl
from jax.experimental.pallas import tpu as pltpu


def _layer_norm(y, eps):
    # LayerNorm with elementwise_affine=False (biased variance), f32 math.
    mean = jnp.mean(y, axis=-1, keepdims=True)
    centered = y - mean
    var = jnp.mean(centered * centered, axis=-1, keepdims=True)
    return centered * lax.rsqrt(var + eps)


def _make_gcn_kernel(TB, TQ, TK, Din, Dout, H, compute_dtype, eps=1e-5):
    """Fused kernel body for fixed tile sizes / dims.  Grid = (b, q, k)."""
    d_k = Dout // H

    def _contrib(x_ref, adj_ref, w_ref):
        # ONE projection matmul for the whole (TB*TK, Din) block, all heads at once.
        x2 = x_ref[...].reshape(TB * TK, Din)
        s = jnp.dot(x2, w_ref[...], preferred_element_type=jnp.float32)
        s = s.reshape(TB, TK, Dout).astype(compute_dtype)
        adj = adj_ref[...]                              # (TB, H, TQ, TK)
        outs = []
        for h in range(H):                              # static unroll over heads
            s_h = s[:, :, h * d_k:(h + 1) * d_k]        # (TB, TK, d_k)
            outs.append(jnp.einsum('bqk,bkd->bqd', adj[:, h], s_h,
                                   preferred_element_type=jnp.float32))
        return outs[0] if H == 1 else jnp.concatenate(outs, axis=-1)  # (TB, TQ, Dout)

    def _accumulate(acc_ref, contrib):
        k = pl.program_id(2)

        @pl.when(k == 0)
        def _():                                        # init from first term
            acc_ref[...] = contrib

        @pl.when(k > 0)
        def _():
            acc_ref[...] += contrib

    if H > 1:
        def kernel(x_ref, adj_ref, w_ref, wo_ref, b_ref, o_ref, acc_ref):
            _accumulate(acc_ref, _contrib(x_ref, adj_ref, w_ref))

            @pl.when(pl.program_id(2) == pl.num_programs(2) - 1)
            def _():
                r = jnp.maximum(acc_ref[...], 0.0).astype(compute_dtype)
                y = jnp.dot(r.reshape(TB * TQ, Dout), wo_ref[...],
                            preferred_element_type=jnp.float32) + b_ref[...]
                o_ref[...] = (_layer_norm(y, eps)
                              .reshape(TB, TQ, Dout).astype(o_ref.dtype))
    else:
        def kernel(x_ref, adj_ref, w_ref, o_ref, acc_ref):
            _accumulate(acc_ref, _contrib(x_ref, adj_ref, w_ref))

            @pl.when(pl.program_id(2) == pl.num_programs(2) - 1)
            def _():
                o_ref[...] = _layer_norm(acc_ref[...], eps).astype(o_ref.dtype)

    return kernel


def _largest_divisor(n, cap, multiple):
    best = None
    t = multiple
    while t <= min(cap, n):
        if n % t == 0:
            best = t
        t += multiple
    return best if best is not None else n


def _pick_tb(B, N):
    """Batch-block size: biggest divisor of B targeting ~256 projection rows,
    while keeping >= 2 grid steps so both v7x TensorCores stay busy."""
    if B <= 1:
        return 1
    cap = max(1, 256 // max(N, 1))
    best = 1
    for t in range(1, min(B, cap) + 1):
        if B % t == 0 and B // t >= 2:
            best = t
    return best


def _pick_n_tiles(N):
    """Full-N blocks while the (H, N, N) adj tile is comfortably small; else
    tile query rows (mult of 8) and adj columns (mult of 128)."""
    if N <= 512:
        return N, N
    tq = _largest_divisor(N, cap=256, multiple=8)
    tk = _largest_divisor(N, cap=512, multiple=128)
    return tq, tk


def gcn_forward(params, x, adj):
    """x: [..., N, Din], adj: [..., H, N, N] (same leading dims).
    Returns [..., N, Dout] in f32.  One fused pallas_call."""
    H = params["num_head"]
    w_t = params["w_t"]                                 # (Din, Dout), bf16
    Din, Dout = w_t.shape
    compute_dtype = w_t.dtype

    lead = x.shape[:-2]
    N = x.shape[-2]
    x3 = x.reshape((-1, N, Din)).astype(compute_dtype)
    adj4 = adj.reshape((-1, H, N, N)).astype(compute_dtype)
    B = x3.shape[0]

    TB = _pick_tb(B, N)
    TQ, TK = _pick_n_tiles(N)
    Bg, Qg, Kg = B // TB, N // TQ, N // TK

    kernel = _make_gcn_kernel(TB, TQ, TK, Din, Dout, H, compute_dtype)

    in_specs = [
        pl.BlockSpec((TB, TK, Din), lambda b, q, k: (b, k, 0)),     # x (k-tile rows)
        pl.BlockSpec((TB, H, TQ, TK), lambda b, q, k: (b, 0, q, k)),  # adj tile
        pl.BlockSpec((Din, Dout), lambda b, q, k: (0, 0)),          # W^T (resident)
    ]
    args = [x3, adj4, w_t]
    if H > 1:
        in_specs += [
            pl.BlockSpec((Dout, Dout), lambda b, q, k: (0, 0)),     # Wo^T (resident)
            pl.BlockSpec((1, Dout), lambda b, q, k: (0, 0)),        # bias (f32)
        ]
        args += [params["wo_t"], params["b_out"].reshape(1, Dout)]

    # Explicit VMEM budget: double-buffered streamed blocks + resident weights
    # + f32 accumulator, capped at 64 MiB (legal on v5e/v6e/v7x).
    es = jnp.dtype(compute_dtype).itemsize
    blk_bytes = (
        2 * (TB * TK * Din * es)                 # x
        + 2 * (TB * H * TQ * TK * es)            # adj
        + 2 * (TB * TQ * Dout * 4)               # out (f32)
        + 2 * (Din * Dout * es)                  # W^T
        + (2 * (Dout * Dout * es) + 2 * Dout * 4 if H > 1 else 0)
        + TB * TQ * Dout * 4                     # acc scratch
    )
    vmem_limit = min(64 * 1024 * 1024, int(blk_bytes * 2) + (16 << 20))

    out = pl.pallas_call(
        kernel,
        out_shape=jax.ShapeDtypeStruct((B, N, Dout), jnp.float32),
        grid=(Bg, Qg, Kg),
        in_specs=in_specs,
        out_specs=pl.BlockSpec((TB, TQ, Dout), lambda b, q, k: (b, q, 0)),
        scratch_shapes=[pltpu.VMEM((TB, TQ, Dout), jnp.float32)],
        compiler_params=pltpu.CompilerParams(
            dimension_semantics=("parallel", "parallel", "arbitrary"),
            vmem_limit_bytes=vmem_limit,
        ),
    )(*args)
    return out.reshape(lead + (N, Dout))


def init_gcn_params(key, in_features, out_features, num_head=1, dtype=jnp.bfloat16):
    """Params mimicking the module's nn.Linear layouts; weight transpose is
    hoisted to setup time and weights are carried in bf16 (MXU-native)."""
    H = num_head
    assert out_features % H == 0
    k1, k2, k3 = jax.random.split(key, 3)
    bound = in_features ** -0.5
    w = jax.random.uniform(k1, (out_features, in_features), jnp.float32, -bound, bound)
    params = {
        "num_head": H,
        "w_t": w.T.astype(dtype),                       # (Din, Dout)
    }
    if H > 1:
        bound_o = out_features ** -0.5
        wo = jax.random.uniform(k2, (out_features, out_features), jnp.float32,
                                -bound_o, bound_o)
        bo = jax.random.uniform(k3, (out_features,), jnp.float32, -bound_o, bound_o)
        params["wo_t"] = wo.T.astype(dtype)             # (Dout, Dout)
        params["b_out"] = bo                            # f32 bias
    return params


def gcn_reference(params, x, adj, eps=1e-5):
    """Pure-JAX (f32) mirror of the PyTorch forward, for correctness checks."""
    H = params["num_head"]
    w_t = params["w_t"].astype(jnp.float32)             # (Din, Dout)
    Dout = w_t.shape[1]
    d_k = Dout // H
    xf = x.astype(jnp.float32)
    adjf = adj.astype(jnp.float32)
    support = xf @ w_t                                   # (..., N, Dout)
    s = support.reshape(support.shape[:-1] + (H, d_k))
    s = jnp.swapaxes(s, -2, -3)                          # (..., H, N, d_k)
    out = jnp.matmul(adjf, s)                            # (..., H, N, d_k)
    out = jnp.swapaxes(out, -2, -3)                      # (..., N, H, d_k)
    out = out.reshape(out.shape[:-2] + (Dout,))          # (..., N, Dout)
    if H > 1:
        out = jnp.maximum(out, 0.0) @ params["wo_t"].astype(jnp.float32) + params["b_out"]
    mean = out.mean(-1, keepdims=True)
    var = jnp.square(out - mean).mean(-1, keepdims=True)
    return (out - mean) / jnp.sqrt(var + eps)


if __name__ == "__main__":
    key = jax.random.PRNGKey(0)
    kp, kx, ka, kp1, ka1 = jax.random.split(key, 5)

    B, N, Din, Dout = 2, 16, 32, 128   # batch=2, 16 nodes, in=32, out=128 (lane-dense)

    # --- multi-head path (num_head=2): projection -> per-head adj matmul ->
    #     ReLU -> output Linear -> LayerNorm, all in one pallas_call ----------
    H = 2
    params = init_gcn_params(kp, Din, Dout, num_head=H)
    x = jax.random.normal(kx, (B, N, Din), jnp.float32).astype(jnp.bfloat16)
    adj = jax.nn.softmax(jax.random.normal(ka, (B, H, N, N), jnp.float32),
                         axis=-1).astype(jnp.bfloat16)

    out = jax.block_until_ready(gcn_forward(params, x, adj))
    ref = gcn_reference(params, x, adj)
    assert out.shape == (B, N, Dout)
    # bf16 intermediates (s, relu-concat) inside the kernel -> slightly loosened tol.
    assert jnp.allclose(out, ref, atol=2e-2, rtol=2e-2), \
        float(jnp.max(jnp.abs(out - ref)))

    # --- single-head path (num_head=1, module default): projection ->
    #     adj matmul -> LayerNorm ---------------------------------------------
    params1 = init_gcn_params(kp1, Din, Dout, num_head=1)
    adj1 = jax.nn.softmax(jax.random.normal(ka1, (B, 1, N, N), jnp.float32),
                          axis=-1).astype(jnp.bfloat16)
    out1 = jax.block_until_ready(gcn_forward(params1, x, adj1))
    ref1 = gcn_reference(params1, x, adj1)
    assert out1.shape == (B, N, Dout)
    assert jnp.allclose(out1, ref1, atol=2e-2, rtol=2e-2), \
        float(jnp.max(jnp.abs(out1 - ref1)))

    print("KERNEL_OK")
</pallas_src>

<mosaic_0001>
module attributes {stable_mosaic.version = 11 : i64} {
  func.func @kernel(%arg0: i32, %arg1: i32, %arg2: i32, %arg3: memref<1x16x32xbf16, #tpu.memory_space<vmem>>, %arg4: memref<1x2x16x16xbf16, #tpu.memory_space<vmem>>, %arg5: memref<32x128xbf16, #tpu.memory_space<vmem>>, %arg6: memref<128x128xbf16, #tpu.memory_space<vmem>>, %arg7: memref<1x128xf32, #tpu.memory_space<vmem>>, %arg8: memref<1x16x128xf32, #tpu.memory_space<vmem>>, %arg9: memref<1x16x128xf32, #tpu.memory_space<vmem>>) attributes {dimension_semantics = [#tpu.dimension_semantics<parallel>, #tpu.dimension_semantics<parallel>, #tpu.dimension_semantics<arbitrary>], iteration_bounds = array<i64: 2, 1, 1>, scalar_prefetch = 0 : i64, scratch_operands = 1 : i64, tpu.core_type = #tpu.core_type<tc>, window_params = [{transform_indices = @transform_0, window_bounds = array<i64: 1, 16, 32>}, {transform_indices = @transform_1, window_bounds = array<i64: 1, 2, 16, 16>}, {pipeline_mode = #tpu.pipeline_mode<synchronous>, transform_indices = @transform_2, window_bounds = array<i64: 32, 128>}, {pipeline_mode = #tpu.pipeline_mode<synchronous>, transform_indices = @transform_3, window_bounds = array<i64: 128, 128>}, {pipeline_mode = #tpu.pipeline_mode<synchronous>, transform_indices = @transform_4, window_bounds = array<i64: 1, 128>}, {transform_indices = @transform_5, window_bounds = array<i64: 1, 16, 128>}]} {
    %c0 = arith.constant 0 : index
    %c0_0 = arith.constant 0 : index
    %c0_1 = arith.constant 0 : index
    %0 = vector.load %arg3[%c0, %c0_0, %c0_1] : memref<1x16x32xbf16, #tpu.memory_space<vmem>>, vector<1x16x32xbf16>
    %1 = vector.shape_cast %0 : vector<1x16x32xbf16> to vector<16x32xbf16>
    %c0_2 = arith.constant 0 : index
    %c0_3 = arith.constant 0 : index
    %2 = vector.load %arg5[%c0_2, %c0_3] : memref<32x128xbf16, #tpu.memory_space<vmem>>, vector<32x128xbf16>
    %cst = arith.constant dense<0.000000e+00> : vector<16x128xf32>
    %3 = tpu.matmul %1, %2, %cst {dimension_numbers = #tpu.dot_dimension_numbers<[1], [0], [0], [1], [0, 0, 1, 1], [], []>} : vector<16x32xbf16>, vector<32x128xbf16>, vector<16x128xf32> -> vector<16x128xf32>
    %4 = vector.shape_cast %3 : vector<16x128xf32> to vector<1x16x128xf32>
    %5 = arith.truncf %4 : vector<1x16x128xf32> to vector<1x16x128xbf16>
    %c0_4 = arith.constant 0 : index
    %c0_5 = arith.constant 0 : index
    %c0_6 = arith.constant 0 : index
    %c0_7 = arith.constant 0 : index
    %6 = vector.load %arg4[%c0_4, %c0_5, %c0_6, %c0_7] : memref<1x2x16x16xbf16, #tpu.memory_space<vmem>>, vector<1x2x16x16xbf16>
    %7 = vector.extract_strided_slice %5 {offsets = [0, 0, 0], sizes = [1, 16, 64], strides = [1, 1, 1]} : vector<1x16x128xbf16> to vector<1x16x64xbf16>
    %8 = vector.extract_strided_slice %6 {offsets = [0, 0, 0, 0], sizes = [1, 1, 16, 16], strides = [1, 1, 1, 1]} : vector<1x2x16x16xbf16> to vector<1x1x16x16xbf16>
    %9 = vector.shape_cast %8 : vector<1x1x16x16xbf16> to vector<1x16x16xbf16>
    "tpu.trace_start"() <{level = 10 : i32, message = "bqk,bkd->bqd"}> : () -> ()
    %cst_8 = arith.constant dense<0.000000e+00> : vector<1x16x64xf32>
    %10 = tpu.matmul %9, %7, %cst_8 {dimension_numbers = #tpu.dot_dimension_numbers<[2], [1], [1], [2], [0, 0, 0, 1, 1, 2], [0], [0]>} : vector<1x16x16xbf16>, vector<1x16x64xbf16>, vector<1x16x64xf32> -> vector<1x16x64xf32>
    "tpu.trace_stop"() : () -> ()
    %11 = vector.extract_strided_slice %5 {offsets = [0, 0, 64], sizes = [1, 16, 64], strides = [1, 1, 1]} : vector<1x16x128xbf16> to vector<1x16x64xbf16>
    %12 = vector.extract_strided_slice %6 {offsets = [0, 1, 0, 0], sizes = [1, 1, 16, 16], strides = [1, 1, 1, 1]} : vector<1x2x16x16xbf16> to vector<1x1x16x16xbf16>
    %13 = vector.shape_cast %12 : vector<1x1x16x16xbf16> to vector<1x16x16xbf16>
    "tpu.trace_start"() <{level = 10 : i32, message = "bqk,bkd->bqd"}> : () -> ()
    %cst_9 = arith.constant dense<0.000000e+00> : vector<1x16x64xf32>
    %14 = tpu.matmul %13, %11, %cst_9 {dimension_numbers = #tpu.dot_dimension_numbers<[2], [1], [1], [2], [0, 0, 0, 1, 1, 2], [0], [0]>} : vector<1x16x16xbf16>, vector<1x16x64xbf16>, vector<1x16x64xf32> -> vector<1x16x64xf32>
    "tpu.trace_stop"() : () -> ()
    %15 = tpu.concatenate %10, %14 in 2 : vector<1x16x64xf32>, vector<1x16x64xf32> -> vector<1x16x128xf32>
    %c0_i32 = arith.constant 0 : i32
    %16 = arith.cmpi eq, %arg2, %c0_i32 : i32
    %17 = arith.extui %16 : i1 to i32
    %c0_i32_10 = arith.constant 0 : i32
    %18 = arith.cmpi ne, %17, %c0_i32_10 : i32
    scf.if %18 {
      %c0_15 = arith.constant 0 : index
      %c0_16 = arith.constant 0 : index
      %c0_17 = arith.constant 0 : index
      %25 = vector.load %arg9[%c0_15, %c0_16, %c0_17] : memref<1x16x128xf32, #tpu.memory_space<vmem>>, vector<1x16x128xf32>
      tpu.vector_store %arg9[%c0_15, %c0_16, %c0_17], %15 {strides = array<i32>} : memref<1x16x128xf32, #tpu.memory_space<vmem>>, vector<1x16x128xf32>,
    } else {
    }
    %c0_i32_11 = arith.constant 0 : i32
    %19 = arith.cmpi sgt, %arg2, %c0_i32_11 : i32
    %20 = arith.extui %19 : i1 to i32
    %c0_i32_12 = arith.constant 0 : i32
    %21 = arith.cmpi ne, %20, %c0_i32_12 : i32
    scf.if %21 {
      %c0_15 = arith.constant 0 : index
      %c0_16 = arith.constant 0 : index
      %c0_17 = arith.constant 0 : index
      %25 = vector.load %arg9[%c0_15, %c0_16, %c0_17] : memref<1x16x128xf32, #tpu.memory_space<vmem>>, vector<1x16x128xf32>
      %26 = arith.addf %25, %15 : vector<1x16x128xf32>
      %c0_18 = arith.constant 0 : index
      %c0_19 = arith.constant 0 : index
      %c0_20 = arith.constant 0 : index
      %27 = vector.load %arg9[%c0_18, %c0_19, %c0_20] : memref<1x16x128xf32, #tpu.memory_space<vmem>>, vector<1x16x128xf32>
      tpu.vector_store %arg9[%c0_18, %c0_19, %c0_20], %26 {strides = array<i32>} : memref<1x16x128xf32, #tpu.memory_space<vmem>>, vector<1x16x128xf32>,
    } else {
    }
    %c0_i32_13 = arith.constant 0 : i32
    %22 = arith.cmpi eq, %arg2, %c0_i32_13 : i32
    %23 = arith.extui %22 : i1 to i32
    %c0_i32_14 = arith.constant 0 : i32
    %24 = arith.cmpi ne, %23, %c0_i32_14 : i32
    scf.if %24 {
      %c0_15 = arith.constant 0 : index
      %c0_16 = arith.constant 0 : index
      %c0_17 = arith.constant 0 : index
      %25 = vector.load %arg9[%c0_15, %c0_16, %c0_17] : memref<1x16x128xf32, #tpu.memory_space<vmem>>, vector<1x16x128xf32>
      %cst_18 = arith.constant 0.000000e+00 : f32
      %26 = vector.broadcast %cst_18 : f32 to vector<1x16x128xf32>
      %27 = arith.maximumf %25, %26 : vector<1x16x128xf32>
      %28 = arith.truncf %27 : vector<1x16x128xf32> to vector<1x16x128xbf16>
      %29 = vector.shape_cast %28 : vector<1x16x128xbf16> to vector<16x128xbf16>
      %c0_19 = arith.constant 0 : index
      %c0_20 = arith.constant 0 : index
      %30 = vector.load %arg6[%c0_19, %c0_20] : memref<128x128xbf16, #tpu.memory_space<vmem>>, vector<128x128xbf16>
      %cst_21 = arith.constant dense<0.000000e+00> : vector<16x128xf32>
      %31 = tpu.matmul %29, %30, %cst_21 {dimension_numbers = #tpu.dot_dimension_numbers<[1], [0], [0], [1], [0, 0, 1, 1], [], []>} : vector<16x128xbf16>, vector<128x128xbf16>, vector<16x128xf32> -> vector<16x128xf32>
      %c0_22 = arith.constant 0 : index
      %c0_23 = arith.constant 0 : index
      %32 = vector.load %arg7[%c0_22, %c0_23] : memref<1x128xf32, #tpu.memory_space<vmem>>, vector<1x128xf32>
      %33 = vector.broadcast %32 : vector<1x128xf32> to vector<16x128xf32>
      %34 = arith.addf %31, %33 : vector<16x128xf32>
      %cst_24 = arith.constant dense<0.000000e+00> : vector<16xf32>
      %35 = vector.multi_reduction <add>, %34, %cst_24 [1] : vector<16x128xf32> to vector<16xf32>
      %36 = vector.shape_cast %35 : vector<16xf32> to vector<16x1xf32>
      %cst_25 = arith.constant 1.280000e+02 : f32
      %37 = vector.broadcast %cst_25 : f32 to vector<16x1xf32>
      %38 = arith.divf %36, %37 : vector<16x1xf32>
      %39 = vector.broadcast %38 : vector<16x1xf32> to vector<16x128xf32>
      %40 = arith.subf %34, %39 : vector<16x128xf32>
      %41 = arith.mulf %40, %40 : vector<16x128xf32>
      %cst_26 = arith.constant dense<0.000000e+00> : vector<16xf32>
      %42 = vector.multi_reduction <add>, %41, %cst_26 [1] : vector<16x128xf32> to vector<16xf32>
      %43 = vector.shape_cast %42 : vector<16xf32> to vector<16x1xf32>
      %cst_27 = arith.constant 1.280000e+02 : f32
      %44 = vector.broadcast %cst_27 : f32 to vector<16x1xf32>
      %45 = arith.divf %43, %44 : vector<16x1xf32>
      %cst_28 = arith.constant 9.99999974E-6 : f32
      %46 = vector.broadcast %cst_28 : f32 to vector<16x1xf32>
      %47 = arith.addf %45, %46 : vector<16x1xf32>
      %48 = math.rsqrt %47 : vector<16x1xf32>
      %49 = vector.broadcast %48 : vector<16x1xf32> to vector<16x128xf32>
      %50 = arith.mulf %40, %49 : vector<16x128xf32>
      %51 = vector.shape_cast %50 : vector<16x128xf32> to vector<1x16x128xf32>
      %c0_29 = arith.constant 0 : index
      %c0_30 = arith.constant 0 : index
      %c0_31 = arith.constant 0 : index
      %52 = vector.load %arg8[%c0_29, %c0_30, %c0_31] : memref<1x16x128xf32, #tpu.memory_space<vmem>>, vector<1x16x128xf32>
      tpu.vector_store %arg8[%c0_29, %c0_30, %c0_31], %51 {strides = array<i32>} : memref<1x16x128xf32, #tpu.memory_space<vmem>>, vector<1x16x128xf32>,
    } else {
    }
    return
  }
  func.func @transform_0(%arg0: i32, %arg1: i32, %arg2: i32) -> (i32, i32, i32) {
    %c0_i32 = arith.constant 0 : i32
    %c0_i32_0 = arith.constant 0 : i32
    return %arg0, %arg2, %c0_i32 : i32, i32, i32
  }
  func.func @transform_1(%arg0: i32, %arg1: i32, %arg2: i32) -> (i32, i32, i32, i32) {
    %c0_i32 = arith.constant 0 : i32
    %c0_i32_0 = arith.constant 0 : i32
    return %arg0, %c0_i32, %arg1, %arg2 : i32, i32, i32, i32
  }
  func.func @transform_2(%arg0: i32, %arg1: i32, %arg2: i32) -> (i32, i32) {
    %c0_i32 = arith.constant 0 : i32
    %c0_i32_0 = arith.constant 0 : i32
    %c0_i32_1 = arith.constant 0 : i32
    return %c0_i32, %c0_i32_0 : i32, i32
  }
  func.func @transform_3(%arg0: i32, %arg1: i32, %arg2: i32) -> (i32, i32) {
    %c0_i32 = arith.constant 0 : i32
    %c0_i32_0 = arith.constant 0 : i32
    %c0_i32_1 = arith.constant 0 : i32
    return %c0_i32, %c0_i32_0 : i32, i32
  }
  func.func @transform_4(%arg0: i32, %arg1: i32, %arg2: i32) -> (i32, i32) {
    %c0_i32 = arith.constant 0 : i32
    %c0_i32_0 = arith.constant 0 : i32
    %c0_i32_1 = arith.constant 0 : i32
    return %c0_i32, %c0_i32_0 : i32, i32
  }
  func.func @transform_5(%arg0: i32, %arg1: i32, %arg2: i32) -> (i32, i32, i32) {
    %c0_i32 = arith.constant 0 : i32
    %c0_i32_0 = arith.constant 0 : i32
    return %arg0, %arg1, %c0_i32 : i32, i32, i32
  }
}

</mosaic_0001>

<bundles_post_ra>
// kernel: tpu_custom_call.1
= control target key start
LH: loop header
LB: loop body
LE: loop exit
PB: predicated region body
PF: predicated region fallthrough
CT: control target
= control target key end

     0   :  { %s1422_s0 = inlined_call_operand.hbm [shape: bf16[2,16,32], index: 0, kind: input, shape index: {}]   ;;  %s1423_s1 = inlined_call_operand.hbm [shape: bf16[2,2,16,16], index: 1, kind: input, shape index: {}]   ;;  %s1424_s2 = inlined_call_operand.hbm [shape: bf16[32,128], index: 2, kind: input, shape index: {}]   ;;  %s1425_s3 = inlined_call_operand.hbm [shape: bf16[128,128], index: 3, kind: input, shape index: {}]   ;;  %s1426_s4 = inlined_call_operand.vmem [shape: f32[1,128], index: 4, kind: input, shape index: {}]   ;;  %s1427_s5 = inlined_call_operand.hbm [shape: f32[2,16,128], index: 5, kind: output, shape index: {}]  }
   0x1   :  { %1435 = sst [smem:[#allocation21_spill]] %s1424_s2 }
   0x2   :  { %1436 = sst [smem:[#allocation22_spill]] %s1425_s3 }
   0x3   :  { %10 = vsyncpa [#allocation4], 0 }
   0x4   :  { %12 = vsyncpa [#allocation4 + $0x1], 0 }
   0x5   :  { %13 = vsyncpa [#allocation7], 0 }
   0x6   :  { %15 = vsyncpa [#allocation7 + $0x1], 0 }
   0x7   :  { %16 = vsyncpa [#allocation10], 0 }
   0x8   :  { %17 = vsyncpa [#allocation5], 0 }
   0x9   :  { %19 = vsyncpa [#allocation5 + $0x1], 0  ;;  %s1238_s18 = smov 0   ;;  %s1240_s19 = smov 0  }
   0xa   :  { %s1242_s20 = smov 0   ;;  %s1244_s21 = smov 0  }
   0xb   :  { %s1246_s22 = smov 0   ;;  %s1248_s23 = smov 0  }
   0xc LB: > { %1437 = sst [smem:[#allocation17_spill]] %s1186_s20  ;;  %s1269_s24 = sadd.s32 4294967295, %s1198_s23   ;;  %s1198_s23 = sphi %s1248_s23, %s25_s23   ;;  %s1194_s22 = sphi %s1246_s22, %s1457_s22   ;;  %s1190_s21 = sphi %s1244_s21, %s1456_s21   ;;  %s1186_s20 = sphi %s1242_s20, %s1452_s20   ;;  %s1182_s19 = sphi %s1240_s19, %s1455_s19   ;;  %s1178_s18 = sphi %s1238_s18, %s1454_s18  }
   0xd   : > { %s785_s25 = sadd.s32 4294967294, %s1198_s23   ;;  %p66_p0 = scmp.ne.s32.totalorder %s1182_s19, %s1178_s18 }
   0xe   : > { %p67_p1 = scmp.eq.s32.totalorder %s1269_s24, 0  ;;  %p185_p2 = scmp.eq.s32.totalorder %s1269_s24, 1 }
   0xf   : > { %p191_p3 = scmp.eq.s32.totalorder %s785_s25, 1  ;;  %p786_p5 = scmp.ge.s32.totalorder %s1198_s23, 1 }
  0x10   : > { %p1278_p4 = por %p67_p1, %p66_p0  ;;  %p198_p7 = scmp.lt.s32.totalorder %s1198_s23, 3 }
  0x11   : > { %p1283_p6 = por %p191_p3, %p66_p0  ;;  %s1441_s2 = sld [smem:[#allocation21_spill]] }
  0x12   : > { %p1291_p8 = pnand %p786_p5, %p198_p7  ;;  %s1200_s7 = smov [#allocation8]  }
  0x13   : > { %s1439_s27 = scalar_select %p1283_p6, 1, 0 }
  0x14   : > { %p892_p9 = pneg %p1291_p8  ;;  %s211_s8 = sshll.u32 %s1200_s7, 4  ;;  %s212_s8 = int_to_ptr.vmem [resolvable:$true] %s211_s8 }
  0x15   : > { %1440 = sst [smem:[#allocation18_spill]] %s1439_s27  ;;  %p789_p11 = scmp.ge.s32.totalorder %s1198_s23, 2 }
  0x16   : > { %p893_p10 = pnand %p892_p9, %p67_p1  ;;  %s1443_s3 = sld [smem:[#allocation22_spill]] }
  0x17   : > { %s209_s30 = sshll.u32 %s1441_s2, 4  ;;  %s1428_s12 = smov 64   ;;  %s210_s30 = int_to_ptr.hbm [resolvable:$true] %s209_s30 }
  0x18   : > { %s1430_s13 = smov 4   ;;  %s1203_s14 = smov [#allocation9]  }
  0x19   : > { %895 = dma.hbm_to_vmem [thread:$0]  (!%p893_p10), %s210_s30, 256, %s212_s8, [#allocation7], %s1428_s12, %s1428_s12, %s1430_s13  }
  0x1a   : > { %s225_s15 = sshll.u32 %s1203_s14, 4  ;;  %s44_s16 = sadd.s32 1, %s1194_s22  ;;  %s226_s15 = int_to_ptr.vmem [resolvable:$true] %s225_s15 }
  0x1b   : > { %s53_s17 = sadd.s32 1, %s1186_s20  ;;  %p46_p12 = scmp.ge.s32.totalorder %s44_s16, 2 }
  0x1c   : > { %s223_s11 = sshll.u32 %s1443_s3, 4  ;;  %p60_p13 = scmp.ne.s32.totalorder %s1186_s20, %s1182_s19  ;;  %s224_s11 = int_to_ptr.hbm [resolvable:$true] %s223_s11 }
  0x1d   : > { %898 = dma.hbm_to_vmem [thread:$0]  (!%p893_p10), %s224_s11, 1024, %s226_s15, [#allocation10], %s1428_s12, %s1428_s12, %s1430_s13  }
  0x1e   : > { %p61_p0 = scmp.eq.s32.totalorder %s1198_s23, 0  ;;  %p912_p3 = scmp.lt.s32.totalorder %s1198_s23, 2 }
  0x1f   : > { %s1459_s16 = smov (%p46_p12, %s44_s16), 0  ;;  %p1323_p7 = por %p185_p2, %p60_p13 }
  0x20   : > { %1444 = sst [smem:[#allocation19_spill]] %s1459_s16  ;;  %p1317_p5 = por %p61_p0, %p60_p13 }
  0x21   : > { %s48_s29 = ssub.s32 %s1194_s22, %s1459_s16  ;;  %s242_s30 = sand.u32 1, %s1186_s20  }
  0x22   : > { %p51_p9 = scmp.eq.s32.totalorder %s48_s29, 0  ;;  %s790_s7 = sshll.u32 %s242_s30, 3 }
  0x23   : > { %s862_s8 = sshll.u32 %s1194_s22, 3  ;;  %s246_s12 = scalar_lea.vmem [#allocation3], %s790_s7 }
  0x24   : > { %s1332_s9 = scalar_select %p51_p9, %s1186_s20, %s53_s17  }
  0x25   : > { %s253_s14 = scalar_lea.hbm %s1422_s0, %s862_s8  ;;  %s256_s13 = sshll.u32 %s246_s12, 4  ;;  %s257_s13 = int_to_ptr.vmem [resolvable:$true] %s256_s13 }
  0x26   : > { %1447 = sst [smem:[#allocation20_spill]] %s1332_s9  ;;  %s254_s15 = sshll.u32 %s253_s14, 4  ;;  %s255_s15 = int_to_ptr.hbm [resolvable:$true] %s254_s15 }
  0x27   : > { %p900_p2 = pnand %p912_p3, %p1317_p5  ;;  %s266_s2 = sand.u32 1, %s1198_s23  }
  0x28   : > { %s793_s3 = sshll.u32 %s242_s30, 4  ;;  %s243_s16 = scalar_lea.sflag [#allocation4], %s242_s30 }
  0x29   : > { %s1448_s29 = smov 4   ;;  %s1449_s27 = smov 64  }
  0x2a   : > { %902 = dma.hbm_to_vmem [thread:$0]  (!%p900_p2), %s255_s15, 128, %s257_s13, %s243_s16, %s1449_s27, %s1449_s27, %s1448_s29  }
  0x2b   : > { %s863_s17 = sshll.u32 %s1194_s22, 4  ;;  %s270_s9 = scalar_lea.vmem [#allocation6], %s793_s3 }
  0x2c   : > { %s281_s20 = sshll.u32 %s270_s9, 4  ;;  %s278_s7 = scalar_lea.hbm %s1423_s1, %s863_s17  ;;  %s282_s20 = int_to_ptr.vmem [resolvable:$true] %s281_s20 }
  0x2d   : > { %s279_s12 = sshll.u32 %s278_s7, 4  ;;  %s267_s25 = scalar_lea.sflag [#allocation7], %s266_s2  ;;  %s280_s12 = int_to_ptr.hbm [resolvable:$true] %s279_s12 }
  0x2e   : > { %905 = dma.hbm_to_vmem [thread:$0]  (!%p900_p2), %s280_s12, 256, %s282_s20, %s267_s25, %s1449_s27, %s1449_s27, %s1448_s29  }
  0x2f   : > { %293 = sbr.rel (%p1291_p8) target bundleno = 1002 (0x3ea), region = 40  ;;  %s1355_s13 = sand.u32 (!%p1291_p8), 1, %s1182_s19  }
  0x30   : > { %s797_s3 = sshll.u32 (!%p1291_p8), %s1355_s13, 3  ;;  %s296_s16 = scalar_lea.sflag (!%p1291_p8), [#allocation4], %s1355_s13 }
  0x31   : > { %s299_s30 = scalar_lea.vmem (!%p1291_p8), [#allocation3], %s797_s3 }
  0x34   : > { %1157 = dma.done.wait (%p1278_p4), %s296_s16, 128  }
  0x35   : > { %1159 = vsyncadd (%p1278_p4), %s296_s16, 4294967168  ;;  %s305_s2 = sand.u32 1, %s1269_s24   ;;  %s798_s20 = sshll.u32 %s1355_s13, 4 }
  0x36   : > { %s306_s27 = scalar_lea.sflag [#allocation7], %s305_s2  ;;  %s309_s6 = scalar_lea.vmem [#allocation6], %s798_s20 }
  0x37   : > { %1161 = dma.done.wait (%p1278_p4), %s306_s27, 256  }
  0x38   : > { %1163 = vsyncadd (%p1278_p4), %s306_s27, 4294967040 }
  0x39   : > { %1165 = dma.done.wait (%p67_p1), [#allocation7], 256  }
  0x3a   : > { %1167 = vsyncadd (%p67_p1), [#allocation7], 4294967040 }
  0x3b   : > { %1169 = dma.done.wait (%p67_p1), [#allocation10], 1024  }
  0x3c   : > { %1171 = vsyncadd (%p67_p1), [#allocation10], 4294966272  ;;  %v866_v0 = vld [vmem:[#allocation8 + $0x8] sm:$0xff]  ;;  %v865_v1 = vld [vmem:[#allocation8] sm:$0xff]  ;;  %vm379_vm0 = vcmask 261120   ;;  %s1204_s26 = smov 64  }
  0x3d   : > { %389 = vmatpush.bf16.msra.mxu0 %v866_v0  ;;  %v864_v2 = vld [vmem:[%s299_s30] sm:$0xff]  ;;  %v867_v10 = vld [vmem:[%s309_s6] sm:$0xff]  ;;  %vm414_vm1 = vcmask 130048   ;;  %v876_v13 = vld [vmem:[#allocation9 + $0x38] sm:$0xff]  ;;  %vm465_vm2 = vcmask 523264   ;;  %v1205_v43 = vmov 128.0  }
  0x3e   : > { %v868_v12 = vld [vmem:[%s309_s6 + $0x8] sm:$0xff]  ;;  %567 = vmatpush.bf16.msra.mxu3 %v876_v13  ;;  %v875_v14 = vld [vmem:[#allocation9 + $0x30] sm:$0xff]  ;;  %v873_v16 = vld [vmem:[#allocation9 + $0x20] sm:$0xff]  ;;  %978 = vrcp.f32 %v1205_v43  ;;  %s877_s11 = sshll.u32 %s1190_s21, 4  ;;  %s351_s17 = scalar_lea.vmem [#allocation11], %s798_s20 }
  0x3f   : > { %v874_v15 = vld [vmem:[#allocation9 + $0x28] sm:$0xff]  ;;  %v872_v17 = vld [vmem:[#allocation9 + $0x18] sm:$0xff]  ;;  %v871_v21 = vld [vmem:[#allocation9 + $0x10] sm:$0xff]  ;;  %s644_s29 = scalar_lea.hbm %s1427_s5, %s877_s11  ;;  %s645_s10 = sshll.u32 %s351_s17, 4  ;;  %s646_s10 = int_to_ptr.vmem [resolvable:$true] %s645_s10 }
  0x40   : > { %v870_v22 = vld [vmem:[#allocation9 + $0x8] sm:$0xff]  ;;  %v869_v23 = vld [vmem:[#allocation9] sm:$0xff]  ;;  %s647_s8 = sshll.u32 %s644_s29, 4  ;;  %s631_s21 = scalar_lea.sflag [#allocation5], %s1355_s13  ;;  %s648_s8 = int_to_ptr.hbm [resolvable:$true] %s647_s8 }
  0x41   : > { %390 = vmatpush.bf16.msra.mxu0 %v865_v1  ;;  %v977_v38 = vld [vmem:[%s1426_s4] ss:$0 sm:$0xff]  ;;  %s1118_s7 = sshra.s32 %s648_s8, 4  ;;  %s1124_s16 = scalar_lea.hbm %s1427_s5, 32  ;;  %s1119_s7 = int_to_ptr.hbm [resolvable:$true] %s1118_s7 }
  0x42   : > { %568 = vmatpush.bf16.msra.mxu3 %v875_v14  ;;  %s1120_s12 = scalar_lea.hbm %s1119_s7, 16  ;;  %p1125_p10 = scmp.lt.s32.totalorder %s1119_s7, %s1427_s5 }
  0x43   : > { %p1121_p1 = scmp.ne.s32.totalorder %s1119_s7, %s1120_s12  ;;  %p1126_p12 = scmp.lt.s32.totalorder %s1124_s16, %s1120_s12 }
  0x44   : > { %814 = vmatmul.msk.bf16.vlgmr.msra.gmra.mxu0 %vm379_vm0, %v864_v2  ;;  %v979_v44 = vpop.eup %978 }
  0x45   : > { %v586_v45 = vmul.f32 128.0, %v979_v44  ;;  %vm590_vm3 = vweird.f32 %v979_v44  ;;  %p1122_p4 = pnand %p1121_p1, %p1323_p7  ;;  %p1127_p13 = por %p1126_p12, %p1125_p10 }
  0x46   : > { %569 = vmatpush.bf16.msra.mxu3 %v874_v15 }
  0x47   : > { %v587_v46 = vsub.f32 1.0, %v586_v45  ;;  %p1123_p8 = pneg %p1122_p4 }
  0x49   : > { %v588_v47 = vmul.f32 %v979_v44, %v587_v46  ;;  %p1128_p0 = pnand %p1127_p13, %p1123_p8 }
  0x4a   : > { %570 = vmatpush.bf16.msra.mxu3 %v873_v16 }
  0x4b   : > { %v589_v48 = vadd.f32 %v979_v44, %v588_v47 }
  0x4d   : > { %v591_v49 = vsel %vm590_vm3, %v979_v44, %v589_v48 }
  0x4e   : > { %571 = vmatpush.bf16.msra.mxu3 %v872_v17 }
  0x52   : > { %572 = vmatpush.bf16.msra.mxu3 %v871_v21 }
  0x56   : > { %573 = vmatpush.bf16.msra.mxu3 %v870_v22 }
  0x5a   : > { %574 = vmatpush.bf16.msra.mxu3 %v869_v23 }
  0xc1   : > { %v392_v3 = vpop.f32.mrf.mxu0 }
  0xc2   : > { %v397_v4 = vpack.c.bf16 %v392_v3, %v392_v3 }
  0xc4   : > { %v410_v7 = vunpack.c.l.b16 %v397_v4 }
  0xc9   : > { %v394_v5 = vpop.f32.mrf.mxu0 }
  0xca   : > { %v398_v6 = vpack.c.bf16 %v394_v5, %v394_v5 }
  0xcc   : > { %v411_v8 = vunpack.c.l.b16 %v398_v6 }
  0xce   : > { %v412_v9 = vpack.c.b16 %v411_v8, %v410_v7 }
  0xd0   : > { %437 = vrot.lane.b32.xlu0 %v412_v9, %s1204_s26  ;;  %425 = vmatpush.bf16.msra.mxu1 %v412_v9 }
  0xd3   : > { %819 = vmatmul.msk.bf16.vlgmr.msra.gmra.mxu1 %vm414_vm1, %v867_v10 }
 0x142   : > { %v438_v11 = vpop.permute.xlu0 %437 }
 0x143   : > { %450 = vmatpush.bf16.msra.mxu2 %v438_v11 }
 0x146   : > { %824 = vmatmul.msk.bf16.vlgmr.msra.gmra.mxu2 %vm414_vm1, %v868_v12 }
 0x150   : > { %v427_v24 = vpop.f32.mrf.mxu1 }
 0x158   : > { %v429_v28 = vpop.f32.mrf.mxu1 }
 0x1c9   : > { %v452_v18 = vpop.f32.mrf.mxu2 }
 0x1d1   : > { %v454_v19 = vpop.f32.mrf.mxu2 }
 0x1d2   : > { %v972_v20 = vpack.i.bf16 %v454_v19, %v452_v18 }
 0x1d4   : > { %973 = vrot.lane.b32.xlu0 %v972_v20, %s1204_s26 }
 0x246   : > { %v974_v25 = vpop.permute.xlu0 %973 }
 0x247   : > { %v976_v26 = vunpack.i.h.bf16 %v974_v25  ;;  %v975_v27 = vunpack.i.l.bf16 %v974_v25 }
 0x249   : > { %v466_v29 = vsel %vm465_vm2, %v427_v24, %v975_v27  ;;  %v467_v30 = vsel %vm465_vm2, %v429_v28, %v976_v26 }
 0x24a   : > { %v489_v31 = vmax.f32 %v466_v29, 0.0  ;;  %v490_v32 = vmax.f32 %v467_v30, 0.0 }
 0x24c   : > { %v491_v33 = vpack.c.bf16 %v489_v31, %v489_v31  ;;  %v492_v34 = vpack.c.bf16 %v490_v32, %v490_v32 }
 0x24e   : > { %v515_v35 = vunpack.c.l.b16 %v491_v33  ;;  %v516_v36 = vunpack.c.l.b16 %v492_v34 }
 0x250   : > { %v517_v37 = vpack.c.b16 %v516_v36, %v515_v35 }
 0x252   : > { %575 = vmatmul.bf16.vlgmr.msra.gmra.mxu3 %v517_v37 }
 0x2d5   : > { %v576_v39 = vpop.f32.mrf.mxu3 }
 0x2d6   : > { %v577_v40 = vadd.f32 %v977_v38, %v576_v39 }
 0x2d8   : > { %581 = vadd.xlane.f32.xlu1 %v577_v40 }
 0x2dd   : > { %v578_v41 = vpop.f32.mrf.mxu3 }
 0x2de   : > { %v579_v42 = vadd.f32 %v977_v38, %v578_v41 }
 0x2e0   : > { %583 = vadd.xlane.f32.xlu1 %v579_v42 }
 0x34b   : > { %v582_v50 = vpop.xlane.xlu1 %581 }
 0x34c   : > { %v592_v51 = vmul.f32 %v591_v49, %v582_v50 }
 0x34e   : > { %v594_v52 = vsub.f32 %v577_v40, %v592_v51 }
 0x350   : > { %v596_v53 = vmul.f32 %v594_v52, %v594_v52 }
 0x352   : > { %598 = vadd.xlane.f32.xlu2 %v596_v53 }
 0x353   : > { %v584_v54 = vpop.xlane.xlu1 %583 }
 0x354   : > { %v593_v55 = vmul.f32 %v591_v49, %v584_v54 }
 0x356   : > { %v595_v56 = vsub.f32 %v579_v42, %v593_v55 }
 0x358   : > { %v597_v57 = vmul.f32 %v595_v56, %v595_v56 }
 0x35a   : > { %600 = vadd.xlane.f32.xlu2 %v597_v57 }
 0x3c5   : > { %v599_v58 = vpop.xlane.xlu2 %598 }
 0x3c6   : > { %v602_v59 = vmul.f32 %v599_v58, %v591_v49 }
 0x3c8   : > { %v604_v60 = vadd.f32 1e-05, %v602_v59 }
 0x3ca   : > { %980 = vrsqrt.f32 %v604_v60  ;;  %vm612_vm5 = vweird.f32 %v604_v60 }
 0x3cd   : > { %v601_v61 = vpop.xlane.xlu2 %600 }
 0x3ce   : > { %v603_v62 = vmul.f32 %v601_v61, %v591_v49 }
 0x3d0   : > { %v981_v63 = vpop.eup %980  ;;  %v605_v0 = vadd.f32 1e-05, %v603_v62 }
 0x3d1   : > { %v607_v1 = vmul.f32 %v981_v63, %v604_v60  ;;  %vm613_vm4 = vweird.f32 %v981_v63 }
 0x3d2   : > { %982 = vrsqrt.f32 %v605_v0  ;;  %vm614_vm6 = vmor %vm612_vm5, %vm613_vm4  ;;  %vm622_vm8 = vweird.f32 %v605_v0 }
 0x3d3   : > { %v608_v2 = vmul.f32 %v981_v63, %v607_v1 }
 0x3d5   : > { %v609_v3 = vmul.f32 0.5, %v608_v2 }
 0x3d7   : > { %v610_v4 = vsub.f32 1.5, %v609_v3 }
 0x3d8   : > { %v983_v5 = vpop.eup %982 }
 0x3d9   : > { %v611_v6 = vmul.f32 %v981_v63, %v610_v4  ;;  %v617_v7 = vmul.f32 %v983_v5, %v605_v0  ;;  %vm623_vm7 = vweird.f32 %v983_v5 }
 0x3da   : > { %vm624_vm9 = vmor %vm622_vm8, %vm623_vm7 }
 0x3db   : > { %v615_v8 = vsel %vm614_vm6, %v981_v63, %v611_v6  ;;  %v618_v9 = vmul.f32 %v983_v5, %v617_v7 }
 0x3dc   : > { %v626_v10 = vmul.f32 %v615_v8, %v594_v52 }
 0x3dd   : > { %v619_v11 = vmul.f32 0.5, %v618_v9 }
 0x3de   : > { %628 = vst [vmem:[%s351_s17] sm:$0xff] %v626_v10 }
 0x3df   : > { %v620_v12 = vsub.f32 1.5, %v619_v11 }
 0x3e1   : > { %v621_v13 = vmul.f32 %v983_v5, %v620_v12 }
 0x3e3   : > { %v625_v14 = vsel %vm624_vm9, %v983_v5, %v621_v13 }
 0x3e4   : > { %v627_v15 = vmul.f32 %v625_v14, %v595_v56 }
 0x3e6   : > { %629 = vst [vmem:[%s351_s17 + $0x8] sm:$0xff] %v627_v15 }
 0x3e7   : > { %1131 = shalt.err (!%p1128_p0)
}
 0x3e8   : > { %s1206_s13 = smov 128   ;;  %s1207_s20 = smov 8  }
 0x3e9   : > { %890 = dma.vmem_to_hbm [thread:$0]  (%p1323_p7), %s646_s10, 256, %s648_s8, %s631_s21, %s1206_s13, %s1206_s13, %s1207_s20  }
 0x3ea PF: > { %s662_s6 = sand.u32 1, %s1178_s18   ;;  %p907_p3 = pnand %p789_p11, %p1283_p6 }
 0x3eb   : > { %s663_s26 = scalar_lea.sflag [#allocation5], %s662_s6 }
 0x3ec   : > { %p908_p5 = pneg %p907_p3 }
 0x3ee   : > { %1173 = dma.done.wait (%p908_p5), %s663_s26, 256  }
 0x3ef   : > { %1175 = vsyncadd (%p908_p5), %s663_s26, 4294967040  ;;  %s25_s23 = sadd.s32 1, %s1198_s23   ;;  %s1451_s24 = sld [smem:[#allocation17_spill]] }
 0x3f0   : > { %p22_p9 = scmp.ge.s32.totalorder %s25_s23, 4   ;;  %s1452_s20 = sld [smem:[#allocation20_spill]] }
 0x3f1   : > { %s1453_s28 = sld [smem:[#allocation19_spill]]  ;;  %s1454_s18 = smov %s1182_s19 }
 0x3f2   : > { %s1456_s21 = smov %s1194_s22 }
 0x3f3   :  { %24 = sbr.rel (!%p22_p9) target bundleno = 12 (0xc), region = 118 }
 0x3f5   : > { %s1455_s19 = smov %s1451_s24 }
 0x3f7   : > { %s1457_s22 = smov %s1453_s28 }
 0x3f8   :  { %669 = vsyncpa [#allocation4], 1 }
 0x3f9   :  { %671 = vsyncpa [#allocation4 + $0x1], 1 }
 0x3fa   :  { %672 = vsyncpa [#allocation7], 1 }
 0x3fb   :  { %674 = vsyncpa [#allocation7 + $0x1], 1 }
 0x3fc   :  { %675 = vsyncpa [#allocation10], 1 }
 0x3fd   :  { %676 = vsyncpa [#allocation5], 1 }
 0x3fe   :  { %678 = vsyncpa [#allocation5 + $0x1], 1 }

</bundles_post_ra>
